<compile_context>
chip_gen: v6e
topology: v6e:2x2x1
jax: 0.10.0
libtpu: 0.0.40
codegen_flags: <defaults>
</compile_context>

<pallas_src>
import functools

import jax
import jax.numpy as jnp
from jax.experimental import pallas as pl
from jax.experimental.pallas import tpu as pltpu


def _round_up(x: int, m: int) -> int:
    return ((x + m - 1) // m) * m


def _make_ddne_kernel(alpha: float, beta: float):
    """Kernel closure with alpha/beta baked in as static scalars."""
    alpha_sq = float(alpha) * float(alpha)
    half_beta = 0.5 * float(beta)

    def kernel(adj_ref, gnd_ref, neigh_ref, erow_ref, ecol_ref, out_ref):
        j = pl.program_id(1)

        # Output block is resident across the (arbitrary) column axis and acts
        # as the per-row-block accumulator.
        @pl.when(j == 0)
        def _init():
            out_ref[...] = jnp.zeros_like(out_ref)

        # ---- weighted Frobenius reconstruction term (VPU, f32) ------------
        adj = adj_ref[...].astype(jnp.float32)      # (TM, TN)
        gnd = gnd_ref[...].astype(jnp.float32)      # (TM, TN) (exact bf16->f32)
        d = adj - gnd
        d2 = d * d
        # P**2 baked in: 1 where gnd==0, alpha**2 elsewhere.
        recon_c = jnp.where(gnd == 0.0, d2, jnp.float32(alpha_sq) * d2)

        # ---- graph-Laplacian term (MXU matmul + VPU elementwise) ----------
        # ae[:, :D] = neigh_blk @ emb[colblk]      (for  -trace(E^T A E))
        # ae[:,  D] = neigh_blk @ rowsq(emb)[col]  (for   trace(E^T D E))
        # erow = [-emb[rowblk] | 1]  =>  sum(erow * ae) = t_deg - t_adj (block)
        neigh = neigh_ref[...].astype(jnp.float32)  # (TM, TN)
        ae = jnp.dot(neigh, ecol_ref[...], preferred_element_type=jnp.float32)
        lap_c = erow_ref[...] * ae                  # (TM, D+1)

        partial = jnp.sum(recon_c) + jnp.float32(half_beta) * jnp.sum(lap_c)
        out_ref[...] = out_ref[...] + partial       # scalar broadcast into slab

    return kernel


def ddne_loss(adj_est, gnd, neigh, emb, *, alpha: float, beta: float,
              block_m: int = 512, block_n: int = 1024,
              binary_gnd_neigh: bool = True):
    """Pallas TPU implementation of DDNE_loss.forward. Returns a scalar f32.

    binary_gnd_neigh=True streams gnd/neigh as bf16 (exact for 0/1 adjacency
    matrices, ~33% less HBM traffic). Set False for arbitrary-valued inputs.
    """
    N = adj_est.shape[0]
    D = emb.shape[1]
    assert adj_est.shape == (N, N) and gnd.shape == (N, N) and neigh.shape == (N, N)
    assert emb.shape == (N, D)

    adj_est = adj_est.astype(jnp.float32)
    emb = emb.astype(jnp.float32)
    if binary_gnd_neigh:
        gnd = gnd.astype(jnp.bfloat16)
        neigh = neigh.astype(jnp.bfloat16)
    else:
        gnd = gnd.astype(jnp.float32)
        neigh = neigh.astype(jnp.float32)

    # ---- tile sizes / zero-padding to the tile grid ------------------------
    tm = min(_round_up(block_m, 8), _round_up(N, 8))
    tn = min(_round_up(block_n, 128), _round_up(N, 128))
    np_m = _round_up(N, tm)
    np_n = _round_up(N, tn)
    nr, nc = np_m // tm, np_n // tn
    pad_m, pad_n = np_m - N, np_n - N

    if pad_m or pad_n:
        adj_est = jnp.pad(adj_est, ((0, pad_m), (0, pad_n)))
        gnd = jnp.pad(gnd, ((0, pad_m), (0, pad_n)))
        neigh = jnp.pad(neigh, ((0, pad_m), (0, pad_n)))

    # ---- tiny resident emb-derived operands (degree term folded in) --------
    rsq = jnp.sum(emb * emb, axis=1, keepdims=True)                  # (N, 1)
    ecol = jnp.concatenate([emb, rsq], axis=1)                       # (N, D+1)
    erow = jnp.concatenate([-emb, jnp.ones((N, 1), jnp.float32)], axis=1)
    if pad_n:
        ecol = jnp.pad(ecol, ((0, pad_n), (0, 0)))
    if pad_m:
        erow = jnp.pad(erow, ((0, pad_m), (0, 0)))
    da = D + 1

    kernel = _make_ddne_kernel(alpha, beta)

    out = pl.pallas_call(
        kernel,
        out_shape=jax.ShapeDtypeStruct((nr, 8, 128), jnp.float32),
        grid=(nr, nc),
        in_specs=[
            pl.BlockSpec((tm, tn), lambda i, j: (i, j)),   # adj_est
            pl.BlockSpec((tm, tn), lambda i, j: (i, j)),   # gnd
            pl.BlockSpec((tm, tn), lambda i, j: (i, j)),   # neigh
            pl.BlockSpec((tm, da), lambda i, j: (i, 0)),   # erow = [-emb | 1]
            pl.BlockSpec((tn, da), lambda i, j: (j, 0)),   # ecol = [emb | rsq]
        ],
        out_specs=pl.BlockSpec((1, 8, 128), lambda i, j: (i, 0, 0)),
        compiler_params=pltpu.CompilerParams(
            dimension_semantics=("parallel", "arbitrary"),
            vmem_limit_bytes=32 * 1024 * 1024,
        ),
    )(adj_est, gnd, neigh, erow, ecol)

    # Every lane of each row-block slab holds the same partial; sum them.
    return jnp.sum(out[:, 0, 0])


def ddne_loss_ref(adj_est, gnd, neigh, emb, *, alpha: float, beta: float):
    """Pure-JAX reference mirroring the PyTorch forward exactly."""
    adj_est = adj_est.astype(jnp.float32)
    gnd = gnd.astype(jnp.float32)
    neigh = neigh.astype(jnp.float32)
    emb = emb.astype(jnp.float32)
    p = jnp.where(gnd == 0, 1.0, alpha)
    loss = jnp.sum(((adj_est - gnd) * p) ** 2)
    deg = jnp.diag(jnp.sum(neigh, axis=0))
    lap = deg - neigh
    loss += beta / 2.0 * jnp.trace(emb.T @ (lap @ emb))
    return loss


if __name__ == "__main__":
    # Deterministic synthetic inputs, small & non-tile-aligned (exercises padding).
    N, D = 200, 8
    alpha, beta = 2.0, 0.1

    key = jax.random.PRNGKey(0)
    k1, k2, k3, k4 = jax.random.split(key, 4)
    adj_est = jax.random.uniform(k1, (N, N), dtype=jnp.float32)
    gnd = jax.random.bernoulli(k2, 0.3, (N, N)).astype(jnp.float32)
    neigh = jax.random.bernoulli(k3, 0.3, (N, N)).astype(jnp.float32)
    emb = jax.random.normal(k4, (N, D), dtype=jnp.float32)

    loss_ref = jax.block_until_ready(
        ddne_loss_ref(adj_est, gnd, neigh, emb, alpha=alpha, beta=beta))

    # 1) default tiles (single block at this small N), bf16 binary path
    f_default = jax.jit(functools.partial(ddne_loss, alpha=alpha, beta=beta))
    loss_a = jax.block_until_ready(f_default(adj_est, gnd, neigh, emb))

    # 2) small tiles -> 4x2 grid: exercises accumulation, init, padding, megacore axis
    f_tiled = jax.jit(functools.partial(ddne_loss, alpha=alpha, beta=beta,
                                        block_m=64, block_n=128))
    loss_b = jax.block_until_ready(f_tiled(adj_est, gnd, neigh, emb))

    # 3) full-f32 path (no bf16 cast of gnd/neigh)
    f_f32 = jax.jit(functools.partial(ddne_loss, alpha=alpha, beta=beta,
                                      block_m=64, block_n=128,
                                      binary_gnd_neigh=False))
    loss_c = jax.block_until_ready(f_f32(adj_est, gnd, neigh, emb))

    for name, val in (("default", loss_a), ("tiled", loss_b), ("f32", loss_c)):
        if not jnp.allclose(val, loss_ref, rtol=1e-4, atol=1e-4):
            raise AssertionError(f"mismatch ({name}): kernel={val} ref={loss_ref}")
    print("KERNEL_OK")
</pallas_src>

<mosaic_0001>
module attributes {stable_mosaic.version = 11 : i64} {
  func.func @kernel(%arg0: i32, %arg1: i32, %arg2: memref<200x256xf32, #tpu.memory_space<vmem>>, %arg3: memref<200x256xbf16, #tpu.memory_space<vmem>>, %arg4: memref<200x256xbf16, #tpu.memory_space<vmem>>, %arg5: memref<200x9xf32, #tpu.memory_space<vmem>>, %arg6: memref<256x9xf32, #tpu.memory_space<vmem>>, %arg7: memref<1x8x128xf32, #tpu.memory_space<vmem>>) attributes {dimension_semantics = [#tpu.dimension_semantics<parallel>, #tpu.dimension_semantics<arbitrary>], iteration_bounds = array<i64: 1, 1>, scalar_prefetch = 0 : i64, scratch_operands = 0 : i64, tpu.core_type = #tpu.core_type<tc>, window_params = [{transform_indices = @transform_0, window_bounds = array<i64: 200, 256>}, {transform_indices = @transform_1, window_bounds = array<i64: 200, 256>}, {transform_indices = @transform_2, window_bounds = array<i64: 200, 256>}, {transform_indices = @transform_3, window_bounds = array<i64: 200, 9>}, {transform_indices = @transform_4, window_bounds = array<i64: 256, 9>}, {transform_indices = @transform_5, window_bounds = array<i64: 1, 8, 128>}]} {
    %c0_i32 = arith.constant 0 : i32
    %0 = arith.cmpi eq, %arg1, %c0_i32 : i32
    %1 = arith.extui %0 : i1 to i32
    %c0_i32_0 = arith.constant 0 : i32
    %2 = arith.cmpi ne, %1, %c0_i32_0 : i32
    scf.if %2 {
      %cst_21 = arith.constant 0.000000e+00 : f32
      %33 = vector.broadcast %cst_21 : f32 to vector<1x8x128xf32>
      %c0_22 = arith.constant 0 : index
      %c0_23 = arith.constant 0 : index
      %c0_24 = arith.constant 0 : index
      %34 = vector.load %arg7[%c0_22, %c0_23, %c0_24] : memref<1x8x128xf32, #tpu.memory_space<vmem>>, vector<1x8x128xf32>
      tpu.vector_store %arg7[%c0_22, %c0_23, %c0_24], %33 {strides = array<i32>} : memref<1x8x128xf32, #tpu.memory_space<vmem>>, vector<1x8x128xf32>,
    } else {
    }
    %c0 = arith.constant 0 : index
    %c0_1 = arith.constant 0 : index
    %3 = vector.load %arg2[%c0, %c0_1] : memref<200x256xf32, #tpu.memory_space<vmem>>, vector<200x256xf32>
    %c0_2 = arith.constant 0 : index
    %c0_3 = arith.constant 0 : index
    %4 = vector.load %arg3[%c0_2, %c0_3] : memref<200x256xbf16, #tpu.memory_space<vmem>>, vector<200x256xbf16>
    %5 = arith.extf %4 : vector<200x256xbf16> to vector<200x256xf32>
    %6 = arith.subf %3, %5 : vector<200x256xf32>
    %7 = arith.mulf %6, %6 : vector<200x256xf32>
    %cst = arith.constant 0.000000e+00 : f32
    %8 = vector.broadcast %cst : f32 to vector<200x256xf32>
    %9 = arith.cmpf oeq, %5, %8 : vector<200x256xf32>
    %cst_4 = arith.constant 4.000000e+00 : f32
    %10 = vector.broadcast %cst_4 : f32 to vector<200x256xf32>
    %11 = arith.mulf %10, %7 : vector<200x256xf32>
    %12 = arith.select %9, %7, %11 : vector<200x256xi1>, vector<200x256xf32>
    %c0_5 = arith.constant 0 : index
    %c0_6 = arith.constant 0 : index
    %13 = vector.load %arg4[%c0_5, %c0_6] : memref<200x256xbf16, #tpu.memory_space<vmem>>, vector<200x256xbf16>
    %14 = arith.extf %13 : vector<200x256xbf16> to vector<200x256xf32>
    %c0_7 = arith.constant 0 : index
    %c0_8 = arith.constant 0 : index
    %15 = vector.load %arg6[%c0_7, %c0_8] : memref<256x9xf32, #tpu.memory_space<vmem>>, vector<256x9xf32>
    %cst_9 = arith.constant dense<0.000000e+00> : vector<200x9xf32>
    %16 = tpu.matmul %14, %15, %cst_9 {dimension_numbers = #tpu.dot_dimension_numbers<[1], [0], [0], [1], [0, 0, 1, 1], [], []>} : vector<200x256xf32>, vector<256x9xf32>, vector<200x9xf32> -> vector<200x9xf32>
    %c0_10 = arith.constant 0 : index
    %c0_11 = arith.constant 0 : index
    %17 = vector.load %arg5[%c0_10, %c0_11] : memref<200x9xf32, #tpu.memory_space<vmem>>, vector<200x9xf32>
    %18 = arith.mulf %17, %16 : vector<200x9xf32>
    %19 = vector.shape_cast %12 : vector<200x256xf32> to vector<1x200x256xf32>
    %cst_12 = arith.constant dense<0.000000e+00> : vector<1xf32>
    %20 = vector.multi_reduction <add>, %19, %cst_12 [1, 2] : vector<1x200x256xf32> to vector<1xf32>
    %21 = vector.shape_cast %20 : vector<1xf32> to vector<1x1x1xf32>
    %22 = vector.extract %21[0, 0, 0] : f32 from vector<1x1x1xf32>
    %23 = vector.shape_cast %18 : vector<200x9xf32> to vector<1x200x9xf32>
    %cst_13 = arith.constant dense<0.000000e+00> : vector<1xf32>
    %24 = vector.multi_reduction <add>, %23, %cst_13 [1, 2] : vector<1x200x9xf32> to vector<1xf32>
    %25 = vector.shape_cast %24 : vector<1xf32> to vector<1x1x1xf32>
    %26 = vector.extract %25[0, 0, 0] : f32 from vector<1x1x1xf32>
    %cst_14 = arith.constant 5.000000e-02 : f32
    %27 = arith.mulf %cst_14, %26 : f32
    %28 = arith.addf %22, %27 : f32
    %c0_15 = arith.constant 0 : index
    %c0_16 = arith.constant 0 : index
    %c0_17 = arith.constant 0 : index
    %29 = vector.load %arg7[%c0_15, %c0_16, %c0_17] : memref<1x8x128xf32, #tpu.memory_space<vmem>>, vector<1x8x128xf32>
    %30 = vector.broadcast %28 : f32 to vector<1x8x128xf32>
    %31 = arith.addf %29, %30 : vector<1x8x128xf32>
    %c0_18 = arith.constant 0 : index
    %c0_19 = arith.constant 0 : index
    %c0_20 = arith.constant 0 : index
    %32 = vector.load %arg7[%c0_18, %c0_19, %c0_20] : memref<1x8x128xf32, #tpu.memory_space<vmem>>, vector<1x8x128xf32>
    tpu.vector_store %arg7[%c0_18, %c0_19, %c0_20], %31 {strides = array<i32>} : memref<1x8x128xf32, #tpu.memory_space<vmem>>, vector<1x8x128xf32>,
    return
  }
  func.func @transform_0(%arg0: i32, %arg1: i32) -> (i32, i32) {
    %c0_i32 = arith.constant 0 : i32
    return %arg0, %arg1 : i32, i32
  }
  func.func @transform_1(%arg0: i32, %arg1: i32) -> (i32, i32) {
    %c0_i32 = arith.constant 0 : i32
    return %arg0, %arg1 : i32, i32
  }
  func.func @transform_2(%arg0: i32, %arg1: i32) -> (i32, i32) {
    %c0_i32 = arith.constant 0 : i32
    return %arg0, %arg1 : i32, i32
  }
  func.func @transform_3(%arg0: i32, %arg1: i32) -> (i32, i32) {
    %c0_i32 = arith.constant 0 : i32
    %c0_i32_0 = arith.constant 0 : i32
    return %arg0, %c0_i32 : i32, i32
  }
  func.func @transform_4(%arg0: i32, %arg1: i32) -> (i32, i32) {
    %c0_i32 = arith.constant 0 : i32
    %c0_i32_0 = arith.constant 0 : i32
    return %arg1, %c0_i32 : i32, i32
  }
  func.func @transform_5(%arg0: i32, %arg1: i32) -> (i32, i32, i32) {
    %c0_i32 = arith.constant 0 : i32
    %c0_i32_0 = arith.constant 0 : i32
    %c0_i32_1 = arith.constant 0 : i32
    return %arg0, %c0_i32, %c0_i32_0 : i32, i32, i32
  }
}

</mosaic_0001>

<bundles_post_ra>
// kernel: ddne_loss.1
= control target key start
LH: loop header
LB: loop body
LE: loop exit
PB: predicated region body
PF: predicated region fallthrough
CT: control target
= control target key end

     0   :  { %v943_v0 = vmov 0.0   ;;  %s1877_s4 = inlined_call_operand.vmem [shape: f32[256,9], index: 4, kind: input, shape index: {}]   ;;  %s1878_s2 = inlined_call_operand.vmem [shape: bf16[200,256], index: 2, kind: input, shape index: {}]   ;;  %s1879_s1 = inlined_call_operand.vmem [shape: bf16[200,256], index: 1, kind: input, shape index: {}]   ;;  %s1880_s0 = inlined_call_operand.vmem [shape: f32[200,256], index: 0, kind: input, shape index: {}]   ;;  %s1881_s3 = inlined_call_operand.vmem [shape: f32[200,9], index: 3, kind: input, shape index: {}]   ;;  %s1882_s5 = inlined_call_operand.vmem [shape: f32[1,8,128], index: 5, kind: output, shape index: {}]  }
   0x1   :  { %507 = vmatprep.subr.mxu0 %v943_v0  ;;  %v490_v1 = vld [vmem:[%s1877_s4 + $0x78] sm:$0xff]  ;;  %v489_v2 = vld [vmem:[%s1877_s4 + $0x70] sm:$0xff]  ;;  %874 = vmatprep.subr.mxu1 %v943_v0  ;;  %v488_v3 = vld [vmem:[%s1877_s4 + $0x68] sm:$0xff] }
   0x2   :  { %508 = vmatpush1.msra.mxu0 %v490_v1  ;;  %906 = vmatpush1.msra.mxu1 %v490_v1  ;;  %v487_v4 = vld [vmem:[%s1877_s4 + $0x60] sm:$0xff]  ;;  %v486_v5 = vld [vmem:[%s1877_s4 + $0x58] sm:$0xff]  ;;  %v485_v6 = vld [vmem:[%s1877_s4 + $0x50] sm:$0xff] }
   0x3   :  { %509 = vmatprep.subr.mxu0 %v943_v0  ;;  %875 = vmatprep.subr.mxu1 %v943_v0  ;;  %v484_v7 = vld [vmem:[%s1877_s4 + $0x48] sm:$0xff]  ;;  %v483_v8 = vld [vmem:[%s1877_s4 + $0x40] sm:$0xff]  ;;  %v482_v9 = vld [vmem:[%s1877_s4 + $0x38] sm:$0xff] }
   0x4   :  { %510 = vmatpush1.msra.mxu0 %v489_v2  ;;  %907 = vmatpush1.msra.mxu1 %v489_v2  ;;  %v481_v10 = vld [vmem:[%s1877_s4 + $0x30] sm:$0xff]  ;;  %v480_v11 = vld [vmem:[%s1877_s4 + $0x28] sm:$0xff]  ;;  %v479_v12 = vld [vmem:[%s1877_s4 + $0x20] sm:$0xff] }
   0x5   :  { %511 = vmatprep.subr.mxu0 %v943_v0  ;;  %876 = vmatprep.subr.mxu1 %v943_v0  ;;  %v478_v13 = vld [vmem:[%s1877_s4 + $0x18] sm:$0xff]  ;;  %v477_v14 = vld [vmem:[%s1877_s4 + $0x10] sm:$0xff]  ;;  %v476_v15 = vld [vmem:[%s1877_s4 + $0x8] sm:$0xff] }
   0x6   :  { %512 = vmatpush1.msra.mxu0 %v488_v3  ;;  %908 = vmatpush1.msra.mxu1 %v488_v3  ;;  %v475_v16 = vld [vmem:[%s1877_s4] sm:$0xff]  ;;  %v506_v17 = vld [vmem:[%s1877_s4 + $0xf8] sm:$0xff]  ;;  %v505_v19 = vld [vmem:[%s1877_s4 + $0xf0] sm:$0xff] }
   0x7   :  { %513 = vmatprep.subr.mxu0 %v943_v0  ;;  %877 = vmatprep.subr.mxu1 %v943_v0  ;;  %v1060_v18 = vld [vmem:[%s1878_s2] sm:$0xff]  ;;  %v504_v20 = vld [vmem:[%s1877_s4 + $0xe8] sm:$0xff]  ;;  %v502_v23 = vld [vmem:[%s1877_s4 + $0xd8] sm:$0xff] }
   0x8   :  { %514 = vmatpush1.msra.mxu0 %v487_v4  ;;  %909 = vmatpush1.msra.mxu1 %v487_v4  ;;  %v426_v21 = vunpack.c.h.bf16 %v1060_v18  ;;  %v503_v22 = vld [vmem:[%s1877_s4 + $0xe0] sm:$0xff]  ;;  %v501_v24 = vld [vmem:[%s1877_s4 + $0xd0] sm:$0xff]  ;;  %v500_v25 = vld [vmem:[%s1877_s4 + $0xc8] sm:$0xff]  ;;  %v425_v37 = vunpack.c.l.bf16 %v1060_v18 }
   0x9   :  { %515 = vmatprep.subr.mxu0 %v943_v0  ;;  %878 = vmatprep.subr.mxu1 %v943_v0  ;;  %v499_v26 = vld [vmem:[%s1877_s4 + $0xc0] sm:$0xff]  ;;  %v498_v27 = vld [vmem:[%s1877_s4 + $0xb8] sm:$0xff]  ;;  %v497_v28 = vld [vmem:[%s1877_s4 + $0xb0] sm:$0xff] }
   0xa   :  { %516 = vmatpush1.msra.mxu0 %v486_v5  ;;  %910 = vmatpush1.msra.mxu1 %v486_v5  ;;  %v496_v29 = vld [vmem:[%s1877_s4 + $0xa8] sm:$0xff]  ;;  %v495_v30 = vld [vmem:[%s1877_s4 + $0xa0] sm:$0xff]  ;;  %v494_v31 = vld [vmem:[%s1877_s4 + $0x98] sm:$0xff] }
   0xb   :  { %517 = vmatprep.subr.mxu0 %v943_v0  ;;  %879 = vmatprep.subr.mxu1 %v943_v0  ;;  %v493_v32 = vld [vmem:[%s1877_s4 + $0x90] sm:$0xff]  ;;  %v492_v33 = vld [vmem:[%s1877_s4 + $0x88] sm:$0xff]  ;;  %v491_v36 = vld [vmem:[%s1877_s4 + $0x80] sm:$0xff] }
   0xc   :  { %518 = vmatpush1.msra.mxu0 %v485_v6  ;;  %911 = vmatpush1.msra.mxu1 %v485_v6  ;;  %v401_v34 = vld [vmem:[%s1878_s2 + $0x8] sm:$0xff]  ;;  %v414_v38 = vld [vmem:[%s1878_s2 + $0x70] sm:$0xff]  ;;  %v415_v45 = vld [vmem:[%s1878_s2 + $0x78] sm:$0xff] }
   0xd   :  { %519 = vmatprep.subr.mxu0 %v943_v0  ;;  %880 = vmatprep.subr.mxu1 %v943_v0  ;;  %v413_v35 = vld [vmem:[%s1878_s2 + $0x68] sm:$0xff]  ;;  %v428_v39 = vunpack.c.h.bf16 %v401_v34  ;;  %v402_v41 = vld [vmem:[%s1878_s2 + $0x10] sm:$0xff]  ;;  %v454_v43 = vunpack.c.h.bf16 %v414_v38  ;;  %v427_v44 = vunpack.c.l.bf16 %v401_v34  ;;  %v403_v47 = vld [vmem:[%s1878_s2 + $0x18] sm:$0xff]  ;;  %v453_v48 = vunpack.c.l.bf16 %v414_v38 }
   0xe   :  { %520 = vmatpush1.msra.mxu0 %v484_v7  ;;  %912 = vmatpush1.msra.mxu1 %v484_v7  ;;  %v452_v40 = vunpack.c.h.bf16 %v413_v35  ;;  %v451_v42 = vunpack.c.l.bf16 %v413_v35  ;;  %v430_v46 = vunpack.c.h.bf16 %v402_v41  ;;  %v456_v49 = vunpack.c.h.bf16 %v415_v45  ;;  %v416_v51 = vld [vmem:[%s1878_s2 + $0x80] sm:$0xff]  ;;  %v417_v57 = vld [vmem:[%s1878_s2 + $0x88] sm:$0xff]  ;;  %v418_v63 = vld [vmem:[%s1878_s2 + $0x90] sm:$0xff] }
   0xf   :  { %521 = vmatprep.subr.mxu0 %v943_v0  ;;  %881 = vmatprep.subr.mxu1 %v943_v0  ;;  %v429_v50 = vunpack.c.l.bf16 %v402_v41  ;;  %v432_v52 = vunpack.c.h.bf16 %v403_v47  ;;  %v404_v53 = vld [vmem:[%s1878_s2 + $0x20] sm:$0xff]  ;;  %v455_v54 = vunpack.c.l.bf16 %v415_v45  ;;  %v458_v55 = vunpack.c.h.bf16 %v416_v51  ;;  %v405_v59 = vld [vmem:[%s1878_s2 + $0x28] sm:$0xff]  ;;  %v406_v1 = vld [vmem:[%s1878_s2 + $0x30] sm:$0xff] }
  0x10   :  { %522 = vmatpush1.msra.mxu0 %v483_v8  ;;  %913 = vmatpush1.msra.mxu1 %v483_v8  ;;  %v431_v56 = vunpack.c.l.bf16 %v403_v47  ;;  %v434_v58 = vunpack.c.h.bf16 %v404_v53  ;;  %v457_v60 = vunpack.c.l.bf16 %v416_v51  ;;  %v460_v61 = vunpack.c.h.bf16 %v417_v57  ;;  %v419_v5 = vld [vmem:[%s1878_s2 + $0x98] sm:$0xff]  ;;  %v75_v18 = vld [vmem:[%s1879_s1] sm:$0xff] }
  0x11   :  { %523 = vmatprep.subr.mxu0 %v943_v0  ;;  %882 = vmatprep.subr.mxu1 %v943_v0  ;;  %v433_v62 = vunpack.c.l.bf16 %v404_v53  ;;  %v459_v2 = vunpack.c.l.bf16 %v417_v57  ;;  %v462_v3 = vunpack.c.h.bf16 %v418_v63  ;;  %v435_v4 = vunpack.c.l.bf16 %v405_v59  ;;  %v407_v7 = vld [vmem:[%s1878_s2 + $0x38] sm:$0xff] }
  0x12   :  { %524 = vmatpush1.msra.mxu0 %v482_v9  ;;  %914 = vmatpush1.msra.mxu1 %v482_v9  ;;  %v438_v6 = vunpack.c.h.bf16 %v406_v1  ;;  %v461_v8 = vunpack.c.l.bf16 %v418_v63  ;;  %v464_v9 = vunpack.c.h.bf16 %v419_v5 }
  0x13   :  { %525 = vmatprep.subr.mxu0 %v943_v0  ;;  %883 = vmatprep.subr.mxu1 %v943_v0 }
  0x14   :  { %526 = vmatpush1.msra.mxu0 %v481_v10  ;;  %915 = vmatpush1.msra.mxu1 %v481_v10  ;;  %v437_v10 = vunpack.c.l.bf16 %v406_v1  ;;  %v30_v1 = vld [vmem:[%s1880_s0 + $0x28] sm:$0xff] }
  0x15   :  { %527 = vmatprep.subr.mxu0 %v943_v0  ;;  %884 = vmatprep.subr.mxu1 %v943_v0 }
  0x16   :  { %528 = vmatpush1.msra.mxu0 %v480_v11  ;;  %916 = vmatpush1.msra.mxu1 %v480_v11  ;;  %v420_v11 = vld [vmem:[%s1878_s2 + $0xa0] sm:$0xff] }
  0x17   :  { %529 = vmatprep.subr.mxu0 %v943_v0  ;;  %885 = vmatprep.subr.mxu1 %v943_v0 }
  0x18   :  { %530 = vmatpush1.msra.mxu0 %v479_v12  ;;  %917 = vmatpush1.msra.mxu1 %v479_v12  ;;  %v440_v12 = vunpack.c.h.bf16 %v407_v7 }
  0x19   :  { %531 = vmatprep.subr.mxu0 %v943_v0  ;;  %886 = vmatprep.subr.mxu1 %v943_v0 }
  0x1a   :  { %532 = vmatpush1.msra.mxu0 %v478_v13  ;;  %918 = vmatpush1.msra.mxu1 %v478_v13  ;;  %v408_v13 = vld [vmem:[%s1878_s2 + $0x40] sm:$0xff] }
  0x1b   :  { %533 = vmatprep.subr.mxu0 %v943_v0  ;;  %887 = vmatprep.subr.mxu1 %v943_v0 }
  0x1c   :  { %534 = vmatpush1.msra.mxu0 %v477_v14  ;;  %919 = vmatpush1.msra.mxu1 %v477_v14  ;;  %v463_v14 = vunpack.c.l.bf16 %v419_v5 }
  0x1d   :  { %535 = vmatprep.subr.mxu0 %v943_v0  ;;  %888 = vmatprep.subr.mxu1 %v943_v0 }
  0x1e   :  { %536 = vmatpush1.msra.mxu0 %v476_v15  ;;  %920 = vmatpush1.msra.mxu1 %v476_v15  ;;  %v466_v15 = vunpack.c.h.bf16 %v420_v11 }
  0x1f   :  { %537 = vmatprep.subr.mxu0 %v943_v0  ;;  %889 = vmatprep.subr.mxu1 %v943_v0 }
  0x20   :  { %538 = vmatpush1.msra.mxu0 %v475_v16  ;;  %921 = vmatpush1.msra.mxu1 %v475_v16  ;;  %v439_v16 = vunpack.c.l.bf16 %v407_v7 }
  0x21   :  { %539 = vmatprep.subr.mxu0 %v943_v0  ;;  %890 = vmatprep.subr.mxu1 %v943_v0 }
  0x22   :  { %540 = vmatpush2.msra.mxu0 %v506_v17  ;;  %922 = vmatpush2.msra.mxu1 %v506_v17  ;;  %v421_v17 = vld [vmem:[%s1878_s2 + $0xa8] sm:$0xff] }
  0x23   :  { %541 = vmatprep.subr.mxu0 %v943_v0  ;;  %891 = vmatprep.subr.mxu1 %v943_v0 }
  0x24   :  { %542 = vmatpush2.msra.mxu0 %v505_v19  ;;  %923 = vmatpush2.msra.mxu1 %v505_v19  ;;  %v442_v19 = vunpack.c.h.bf16 %v408_v13 }
  0x25   :  { %543 = vmatprep.subr.mxu0 %v943_v0  ;;  %892 = vmatprep.subr.mxu1 %v943_v0 }
  0x26   :  { %544 = vmatpush2.msra.mxu0 %v504_v20  ;;  %924 = vmatpush2.msra.mxu1 %v504_v20  ;;  %v1198_v20 = vld [vmem:[%s1878_s2 + $0x48] sm:$0xff] }
  0x27   :  { %545 = vmatprep.subr.mxu0 %v943_v0  ;;  %571 = vmatprep.mubr.f32.mxu0 %v426_v21  ;;  %v1203_v21 = vld [vmem:[%s1878_s2 + $0x50] sm:$0xff]  ;;  %v444_v35 = vunpack.c.h.bf16 %v1198_v20 }
  0x28   :  { %546 = vmatpush2.msra.mxu0 %v503_v22  ;;  %893 = vmatprep.subr.mxu1 %v943_v0  ;;  %v445_v38 = vunpack.c.l.bf16 %v1203_v21 }
  0x29   :  { %547 = vmatprep.subr.mxu0 %v943_v0  ;;  %925 = vmatpush2.msra.mxu1 %v503_v22  ;;  %v100_v22 = vunpack.c.l.bf16 %v75_v18 }
  0x2a   :  { %548 = vmatpush2.msra.mxu0 %v502_v23  ;;  %894 = vmatprep.subr.mxu1 %v943_v0 }
  0x2b   :  { %549 = vmatprep.subr.mxu0 %v943_v0  ;;  %926 = vmatpush2.msra.mxu1 %v502_v23  ;;  %v101_v23 = vunpack.c.h.bf16 %v75_v18  ;;  %vm1249_vm0 = vcmp.eq.f32.partialorder %v100_v22, 0.0 }
  0x2c   :  { %550 = vmatpush2.msra.mxu0 %v501_v24  ;;  %895 = vmatprep.subr.mxu1 %v943_v0 }
  0x2d   :  { %551 = vmatprep.subr.mxu0 %v943_v0  ;;  %927 = vmatpush2.msra.mxu1 %v501_v24  ;;  %v441_v24 = vunpack.c.l.bf16 %v408_v13  ;;  %vm1253_vm1 = vcmp.eq.f32.partialorder %v101_v23, 0.0  ;;  %v82_v13 = vld [vmem:[%s1879_s1 + $0x38] sm:$0xff] }
  0x2e   :  { %552 = vmatpush2.msra.mxu0 %v500_v25  ;;  %896 = vmatprep.subr.mxu1 %v943_v0 }
  0x2f   :  { %553 = vmatprep.subr.mxu0 %v943_v0  ;;  %928 = vmatpush2.msra.mxu1 %v500_v25  ;;  %v465_v25 = vunpack.c.l.bf16 %v420_v11 }
  0x30   :  { %554 = vmatpush2.msra.mxu0 %v499_v26  ;;  %897 = vmatprep.subr.mxu1 %v943_v0 }
  0x31   :  { %555 = vmatprep.subr.mxu0 %v943_v0  ;;  %929 = vmatpush2.msra.mxu1 %v499_v26  ;;  %v25_v26 = vld [vmem:[%s1880_s0] sm:$0xff] }
  0x32   :  { %556 = vmatpush2.msra.mxu0 %v498_v27  ;;  %898 = vmatprep.subr.mxu1 %v943_v0 }
  0x33   :  { %557 = vmatprep.subr.mxu0 %v943_v0  ;;  %930 = vmatpush2.msra.mxu1 %v498_v27  ;;  %v26_v27 = vld [vmem:[%s1880_s0 + $0x8] sm:$0xff] }
  0x34   :  { %558 = vmatpush2.msra.mxu0 %v497_v28  ;;  %899 = vmatprep.subr.mxu1 %v943_v0  ;;  %v151_v34 = vsub.f32 %v26_v27, %v101_v23  ;;  %v32_v23 = vld [vmem:[%s1880_s0 + $0x38] sm:$0xff] }
  0x35   :  { %559 = vmatprep.subr.mxu0 %v943_v0  ;;  %931 = vmatpush2.msra.mxu1 %v497_v28  ;;  %v76_v28 = vld [vmem:[%s1879_s1 + $0x8] sm:$0xff] }
  0x36   :  { %560 = vmatpush2.msra.mxu0 %v496_v29  ;;  %900 = vmatprep.subr.mxu1 %v943_v0 }
  0x37   :  { %561 = vmatprep.subr.mxu0 %v943_v0  ;;  %932 = vmatpush2.msra.mxu1 %v496_v29  ;;  %v1217_v29 = vld [vmem:[%s1878_s2 + $0x58] sm:$0xff] }
  0x38   :  { %562 = vmatpush2.msra.mxu0 %v495_v30  ;;  %901 = vmatprep.subr.mxu1 %v943_v0  ;;  %v447_v45 = vunpack.c.l.bf16 %v1217_v29 }
  0x39   :  { %563 = vmatprep.subr.mxu0 %v943_v0  ;;  %933 = vmatpush2.msra.mxu1 %v495_v30  ;;  %v468_v30 = vunpack.c.h.bf16 %v421_v17 }
  0x3a   :  { %564 = vmatpush2.msra.mxu0 %v494_v31  ;;  %902 = vmatprep.subr.mxu1 %v943_v0 }
  0x3b   :  { %565 = vmatprep.subr.mxu0 %v943_v0  ;;  %934 = vmatpush2.msra.mxu1 %v494_v31  ;;  %v1222_v31 = vld [vmem:[%s1878_s2 + $0xb0] sm:$0xff] }
  0x3c   :  { %566 = vmatpush2.msra.mxu0 %v493_v32  ;;  %903 = vmatprep.subr.mxu1 %v943_v0  ;;  %v470_v47 = vunpack.c.h.bf16 %v1222_v31 }
  0x3d   :  { %567 = vmatprep.subr.mxu0 %v943_v0  ;;  %935 = vmatpush2.msra.mxu1 %v493_v32  ;;  %v102_v32 = vunpack.c.l.bf16 %v76_v28 }
  0x3e   :  { %568 = vmatpush2.msra.mxu0 %v492_v33  ;;  %904 = vmatprep.subr.mxu1 %v943_v0 }
  0x3f   :  { %569 = vmatprep.subr.mxu0 %v943_v0  ;;  %936 = vmatpush2.msra.mxu1 %v492_v33  ;;  %v150_v33 = vsub.f32 %v25_v26, %v100_v22  ;;  %vm1264_vm2 = vcmp.eq.f32.partialorder %v102_v32, 0.0 }
  0x40   :  { %570 = vmatpush2.msra.mxu0 %v491_v36  ;;  %905 = vmatprep.subr.mxu1 %v943_v0  ;;  %v436_v0 = vunpack.c.h.bf16 %v405_v59 }
  0x41   :  { %572 = vmatmul.mubr.f32.vlgmr.msra.gmra.mxu0 %v425_v37  ;;  %937 = vmatpush2.msra.mxu1 %v491_v36  ;;  %v443_v36 = vunpack.c.l.bf16 %v1198_v20  ;;  %v446_v37 = vunpack.c.h.bf16 %v1203_v21 }
  0x42   :  { %576 = vmatprep.mubr.f32.mxu0 %v428_v39  ;;  %636 = vmatprep.mubr.f32.mxu1 %v452_v40  ;;  %v27_v39 = vld [vmem:[%s1880_s0 + $0x10] sm:$0xff]  ;;  %v103_v40 = vunpack.c.h.bf16 %v76_v28 }
  0x43   :  { %637 = vmatmul.mubr.f32.vlgmr.msra.gmra.mxu1 %v451_v42  ;;  %v152_v41 = vsub.f32 %v27_v39, %v102_v32  ;;  %v200_v42 = vmul.f32 %v150_v33, %v150_v33 }
  0x44   :  { %641 = vmatprep.mubr.f32.mxu1 %v454_v43  ;;  %v201_v43 = vmul.f32 %v151_v34, %v151_v34  ;;  %vm1281_vm3 = vcmp.eq.f32.partialorder %v103_v40, 0.0  ;;  %v33_v34 = vld [vmem:[%s1880_s0 + $0x40] sm:$0xff] }
  0x45   :  { %577 = vmatmul.mubr.f32.gmra.mxu0 %v427_v44  ;;  %v448_v44 = vunpack.c.h.bf16 %v1217_v29  ;;  %v202_v53 = vmul.f32 %v152_v41, %v152_v41  ;;  %v36_v29 = vld [vmem:[%s1880_s0 + $0x58] sm:$0xff] }
  0x46   :  { %581 = vmatprep.mubr.f32.mxu0 %v430_v46  ;;  %v467_v46 = vunpack.c.l.bf16 %v421_v17  ;;  %v301_v59 = vmul.f32 4.0, %v201_v43 }
  0x47   :  { %642 = vmatmul.mubr.f32.gmra.mxu1 %v453_v48  ;;  %v28_v48 = vld [vmem:[%s1880_s0 + $0x18] sm:$0xff]  ;;  %v302_v63 = vmul.f32 4.0, %v202_v53 }
  0x48   :  { %646 = vmatprep.mubr.f32.mxu1 %v456_v49  ;;  %v77_v49 = vld [vmem:[%s1879_s1 + $0x10] sm:$0xff]  ;;  %v351_v5 = vsel %vm1253_vm1, %v201_v43, %v301_v59  ;;  %v80_v43 = vld [vmem:[%s1879_s1 + $0x28] sm:$0xff] }
  0x49   :  { %582 = vmatmul.mubr.f32.gmra.mxu0 %v429_v50  ;;  %v1243_v50 = vld [vmem:[%s1878_s2 + $0xb8] sm:$0xff]  ;;  %v104_v51 = vunpack.c.l.bf16 %v77_v49  ;;  %v111_v57 = vunpack.c.h.bf16 %v80_v43 }
  0x4a   :  { %586 = vmatprep.mubr.f32.mxu0 %v432_v52  ;;  %v153_v52 = vsub.f32 %v28_v48, %v103_v40  ;;  %v471_v11 = vunpack.c.l.bf16 %v1243_v50  ;;  %v110_v48 = vunpack.c.l.bf16 %v80_v43 }
  0x4b   :  { %647 = vmatmul.mubr.f32.gmra.mxu1 %v455_v54  ;;  %v300_v54 = vmul.f32 4.0, %v200_v42  ;;  %vm1297_vm4 = vcmp.eq.f32.partialorder %v104_v51, 0.0  ;;  %vm1376_vm11 = vcmp.eq.f32.partialorder %v111_v57, 0.0 }
  0x4c   :  { %651 = vmatprep.mubr.f32.mxu1 %v458_v55  ;;  %v469_v55 = vunpack.c.l.bf16 %v1222_v31  ;;  %vm1367_vm10 = vcmp.eq.f32.partialorder %v110_v48, 0.0 }
  0x4d   :  { %587 = vmatmul.mubr.f32.gmra.mxu0 %v431_v56  ;;  %v29_v56 = vld [vmem:[%s1880_s0 + $0x20] sm:$0xff] }
  0x4e   :  { %591 = vmatprep.mubr.f32.mxu0 %v434_v58 }
  0x4f   :  { %652 = vmatmul.mubr.f32.gmra.mxu1 %v457_v60  ;;  %v105_v60 = vunpack.c.h.bf16 %v77_v49 }
  0x50   :  { %656 = vmatprep.mubr.f32.mxu1 %v460_v61  ;;  %v154_v61 = vsub.f32 %v29_v56, %v104_v51 }
  0x51   :  { %592 = vmatmul.mubr.f32.gmra.mxu0 %v433_v62  ;;  %v203_v62 = vmul.f32 %v153_v52, %v153_v52  ;;  %vm1308_vm5 = vcmp.eq.f32.partialorder %v105_v60, 0.0 }
  0x52   :  { %596 = vmatprep.mubr.f32.mxu0 %v436_v0  ;;  %v472_v0 = vunpack.c.h.bf16 %v1243_v50 }
  0x53   :  { %657 = vmatmul.mubr.f32.gmra.mxu1 %v459_v2  ;;  %v78_v2 = vld [vmem:[%s1879_s1 + $0x18] sm:$0xff] }
  0x54   :  { %661 = vmatprep.mubr.f32.mxu1 %v462_v3  ;;  %v106_v7 = vunpack.c.l.bf16 %v78_v2  ;;  %v107_v17 = vunpack.c.h.bf16 %v78_v2 }
  0x55   :  { %597 = vmatmul.mubr.f32.gmra.mxu0 %v435_v4  ;;  %v350_v4 = vsel %vm1249_vm0, %v200_v42, %v300_v54  ;;  %v34_v42 = vld [vmem:[%s1880_s0 + $0x48] sm:$0xff] }
  0x56   :  { %601 = vmatprep.mubr.f32.mxu0 %v438_v6  ;;  %v1275_v6 = vld [vmem:[%s1878_s2 + $0xc0] sm:$0xff]  ;;  %vm1323_vm6 = vcmp.eq.f32.partialorder %v106_v7, 0.0  ;;  %vm1334_vm7 = vcmp.eq.f32.partialorder %v107_v17, 0.0 }
  0x57   :  { %662 = vmatmul.mubr.f32.gmra.mxu1 %v461_v8  ;;  %v155_v8 = vsub.f32 %v30_v1, %v105_v60  ;;  %v474_v22 = vunpack.c.h.bf16 %v1275_v6  ;;  %v473_v41 = vunpack.c.l.bf16 %v1275_v6  ;;  %v161_v1 = vsub.f32 %v36_v29, %v111_v57  ;;  %v43_v57 = vld [vmem:[%s1880_s0 + $0x90] sm:$0xff] }
  0x58   :  { %666 = vmatprep.mubr.f32.mxu1 %v464_v9  ;;  %v204_v9 = vmul.f32 %v154_v61, %v154_v61 }
  0x59   :  { %602 = vmatmul.mubr.f32.gmra.mxu0 %v437_v10  ;;  %v303_v10 = vmul.f32 4.0, %v203_v62 }
  0x5a   :  { %606 = vmatprep.mubr.f32.mxu0 %v440_v12  ;;  %v31_v12 = vld [vmem:[%s1880_s0 + $0x30] sm:$0xff]  ;;  %v304_v20 = vmul.f32 4.0, %v204_v9 }
  0x5b   :  { %667 = vmatmul.mubr.f32.gmra.mxu1 %v463_v14  ;;  %v352_v14 = vsel %vm1264_vm2, %v202_v53, %v302_v63  ;;  %v156_v18 = vsub.f32 %v31_v12, %v106_v7  ;;  %v353_v26 = vsel %vm1281_vm3, %v203_v62, %v303_v10  ;;  %v35_v53 = vld [vmem:[%s1880_s0 + $0x50] sm:$0xff]  ;;  %v211_v10 = vmul.f32 %v161_v1, %v161_v1  ;;  %v38_v12 = vld [vmem:[%s1880_s0 + $0x68] sm:$0xff] }
  0x5c   :  { %671 = vmatprep.mubr.f32.mxu1 %v466_v15  ;;  %v747_v15 = vadd.f32 %v351_v5, %v350_v4  ;;  %v160_v58 = vsub.f32 %v35_v53, %v110_v48  ;;  %v37_v4 = vld [vmem:[%s1880_s0 + $0x60] sm:$0xff]  ;;  %v42_v48 = vld [vmem:[%s1880_s0 + $0x88] sm:$0xff] }
  0x5d   :  { %607 = vmatmul.mubr.f32.gmra.mxu0 %v439_v16  ;;  %v412_v16 = vld [vmem:[%s1878_s2 + $0x60] sm:$0xff]  ;;  %v206_v31 = vmul.f32 %v156_v18, %v156_v18 }
  0x5e   :  { %611 = vmatprep.mubr.f32.mxu0 %v442_v19  ;;  %v205_v19 = vmul.f32 %v155_v8, %v155_v8  ;;  %v748_v27 = vadd.f32 %v747_v15, %v352_v14  ;;  %v450_v33 = vunpack.c.h.bf16 %v412_v16  ;;  %v449_v52 = vunpack.c.l.bf16 %v412_v16 }
  0x5f   :  { %672 = vmatmul.mubr.f32.gmra.mxu1 %v465_v25  ;;  %v210_v2 = vmul.f32 %v160_v58, %v160_v58 }
  0x60   :  { %676 = vmatprep.mubr.f32.mxu1 %v468_v30  ;;  %v157_v30 = vsub.f32 %v32_v23, %v107_v17  ;;  %v305_v32 = vmul.f32 4.0, %v205_v19  ;;  %v114_v17 = vunpack.c.l.bf16 %v82_v13 }
  0x61   :  { %612 = vmatmul.mubr.f32.gmra.mxu0 %v441_v24  ;;  %v79_v24 = vld [vmem:[%s1879_s1 + $0x20] sm:$0xff] }
  0x62   :  { %616 = vmatprep.mubr.f32.mxu0 %v444_v35  ;;  %v108_v28 = vunpack.c.l.bf16 %v79_v24  ;;  %v109_v39 = vunpack.c.h.bf16 %v79_v24  ;;  %v207_v21 = vmul.f32 %v157_v30, %v157_v30  ;;  %vm1409_vm14 = vcmp.eq.f32.partialorder %v114_v17, 0.0 }
  0x63   :  { %677 = vmatmul.mubr.f32.gmra.mxu1 %v467_v46 }
  0x64   :  { %681 = vmatprep.mubr.f32.mxu1 %v470_v47  ;;  %v158_v40 = vsub.f32 %v33_v34, %v108_v28  ;;  %v159_v49 = vsub.f32 %v34_v42, %v109_v39  ;;  %v307_v51 = vmul.f32 4.0, %v207_v21  ;;  %vm1346_vm8 = vcmp.eq.f32.partialorder %v108_v28, 0.0 }
  0x65   :  { %617 = vmatmul.mubr.f32.gmra.mxu0 %v443_v36  ;;  %v354_v36 = vsel %vm1297_vm4, %v204_v9, %v304_v20  ;;  %vm1355_vm9 = vcmp.eq.f32.partialorder %v109_v39, 0.0  ;;  %v311_v20 = vmul.f32 4.0, %v211_v10 }
  0x66   :  { %621 = vmatprep.mubr.f32.mxu0 %v446_v37  ;;  %v749_v37 = vadd.f32 %v748_v27, %v353_v26  ;;  %v208_v50 = vmul.f32 %v158_v40, %v158_v40  ;;  %v209_v59 = vmul.f32 %v159_v49, %v159_v49  ;;  %v357_v62 = vsel %vm1334_vm7, %v207_v21, %v307_v51  ;;  %v41_v21 = vld [vmem:[%s1880_s0 + $0x80] sm:$0xff]  ;;  %v84_v49 = vld [vmem:[%s1879_s1 + $0x48] sm:$0xff] }
  0x67   :  { %682 = vmatmul.mubr.f32.gmra.mxu1 %v469_v55  ;;  %v115_v26 = vunpack.c.h.bf16 %v82_v13  ;;  %v361_v34 = vsel %vm1376_vm11, %v211_v10, %v311_v20  ;;  %v118_v53 = vunpack.c.l.bf16 %v84_v49  ;;  %v119_v29 = vunpack.c.h.bf16 %v84_v49 }
  0x68   :  { %686 = vmatprep.mubr.f32.mxu1 %v472_v0  ;;  %v750_v47 = vadd.f32 %v749_v37, %v354_v36  ;;  %v308_v60 = vmul.f32 4.0, %v208_v50  ;;  %v309_v3 = vmul.f32 4.0, %v209_v59 }
  0x69   :  { %622 = vmatmul.mubr.f32.gmra.mxu0 %v445_v38  ;;  %v306_v38 = vmul.f32 4.0, %v206_v31  ;;  %vm1418_vm15 = vcmp.eq.f32.partialorder %v115_v26, 0.0  ;;  %vm1451_vm2 = vcmp.eq.f32.partialorder %v118_v53, 0.0  ;;  %vm1460_vm3 = vcmp.eq.f32.partialorder %v119_v29, 0.0 }
  0x6a   :  { %626 = vmatprep.mubr.f32.mxu0 %v448_v44  ;;  %v355_v44 = vsel %vm1308_vm5, %v205_v19, %v305_v32  ;;  %v358_v6 = vsel %vm1346_vm8, %v208_v50, %v308_v60  ;;  %v359_v15 = vsel %vm1355_vm9, %v209_v59, %v309_v3  ;;  %v83_v32 = vld [vmem:[%s1879_s1 + $0x40] sm:$0xff] }
  0x6b   :  { %687 = vmatmul.mubr.f32.gmra.mxu1 %v471_v11  ;;  %v356_v55 = vsel %vm1323_vm6, %v206_v31, %v306_v38  ;;  %v751_v56 = vadd.f32 %v750_v47, %v355_v44  ;;  %v310_v11 = vmul.f32 4.0, %v210_v2  ;;  %v40_v31 = vld [vmem:[%s1880_s0 + $0x78] sm:$0xff]  ;;  %v116_v36 = vunpack.c.l.bf16 %v83_v32 }
  0x6c   :  { %691 = vmatprep.mubr.f32.mxu1 %v474_v22  ;;  %v39_v22 = vld [vmem:[%s1880_s0 + $0x70] sm:$0xff]  ;;  %v165_v37 = vsub.f32 %v40_v31, %v115_v26  ;;  %v117_v43 = vunpack.c.h.bf16 %v83_v32 }
  0x6d   :  { %627 = vmatmul.mubr.f32.gmra.mxu0 %v447_v45  ;;  %v81_v45 = vld [vmem:[%s1879_s1 + $0x30] sm:$0xff]  ;;  %v752_v63 = vadd.f32 %v751_v56, %v356_v55  ;;  %v360_v24 = vsel %vm1367_vm10, %v210_v2, %v310_v11  ;;  %v164_v27 = vsub.f32 %v39_v22, %v114_v17  ;;  %v166_v46 = vsub.f32 %v41_v21, %v116_v36 }
  0x6e   :  { %631 = vmatprep.mubr.f32.mxu0 %v450_v33  ;;  %v112_v0 = vunpack.c.l.bf16 %v81_v45  ;;  %v113_v8 = vunpack.c.h.bf16 %v81_v45  ;;  %v215_v44 = vmul.f32 %v165_v37, %v165_v37  ;;  %v167_v54 = vsub.f32 %v42_v48, %v117_v43  ;;  %v47_v26 = vld [vmem:[%s1880_s0 + $0xb0] sm:$0xff] }
  0x6f   :  { %692 = vmatmul.mubr.f32.gmra.mxu1 %v473_v41  ;;  %v753_v7 = vadd.f32 %v752_v63, %v357_v62  ;;  %v214_v39 = vmul.f32 %v164_v27, %v164_v27  ;;  %v216_v55 = vmul.f32 %v166_v46, %v166_v46  ;;  %v168_v45 = vsub.f32 %v43_v57, %v118_v53  ;;  %v44_v63 = vld [vmem:[%s1880_s0 + $0x98] sm:$0xff]  ;;  %v88_v53 = vld [vmem:[%s1879_s1 + $0x68] sm:$0xff] }
  0x70   :  { %v162_v9 = vsub.f32 %v37_v4, %v112_v0  ;;  %v163_v18 = vsub.f32 %v38_v12, %v113_v8  ;;  %vm1388_vm12 = vcmp.eq.f32.partialorder %v112_v0, 0.0  ;;  %vm1397_vm13 = vcmp.eq.f32.partialorder %v113_v8, 0.0  ;;  %v85_v0 = vld [vmem:[%s1879_s1 + $0x50] sm:$0xff]  ;;  %v45_v8 = vld [vmem:[%s1880_s0 + $0xa0] sm:$0xff] }
  0x71   :  { %632 = vmatmul.mubr.f32.gmra.mxu0 %v449_v52  ;;  %v754_v16 = vadd.f32 %v753_v7, %v358_v6  ;;  %v314_v47 = vmul.f32 4.0, %v214_v39  ;;  %v315_v56 = vmul.f32 4.0, %v215_v44  ;;  %v217_v61 = vmul.f32 %v167_v54, %v167_v54 }
  0x72   :  { %v212_v19 = vmul.f32 %v162_v9, %v162_v9  ;;  %v213_v28 = vmul.f32 %v163_v18, %v163_v18  ;;  %v316_v62 = vmul.f32 4.0, %v216_v55  ;;  %vm1430_vm0 = vcmp.eq.f32.partialorder %v116_v36, 0.0  ;;  %v87_v36 = vld [vmem:[%s1879_s1 + $0x60] sm:$0xff] }
  0x73   :  { %v755_v25 = vadd.f32 %v754_v16, %v359_v15  ;;  %v364_v59 = vsel %vm1409_vm14, %v214_v39, %v314_v47  ;;  %v365_v2 = vsel %vm1418_vm15, %v215_v44, %v315_v56  ;;  %v120_v4 = vunpack.c.l.bf16 %v85_v0  ;;  %v46_v15 = vld [vmem:[%s1880_s0 + $0xa8] sm:$0xff]  ;;  %v86_v16 = vld [vmem:[%s1879_s1 + $0x58] sm:$0xff] }
  0x74   :  { %v312_v30 = vmul.f32 4.0, %v212_v19  ;;  %v313_v40 = vmul.f32 4.0, %v213_v28  ;;  %v169_v5 = vsub.f32 %v44_v63, %v119_v29  ;;  %v218_v6 = vmul.f32 %v168_v45, %v168_v45  ;;  %v51_v29 = vld [vmem:[%s1880_s0 + $0xd0] sm:$0xff] }
  0x75   :  { %v756_v35 = vadd.f32 %v755_v25, %v360_v24  ;;  %v317_v7 = vmul.f32 4.0, %v217_v61  ;;  %vm1439_vm1 = vcmp.eq.f32.partialorder %v117_v43, 0.0  ;;  %v366_v10 = vsel %vm1430_vm0, %v216_v55, %v316_v62  ;;  %v49_v43 = vld [vmem:[%s1880_s0 + $0xc0] sm:$0xff] }
  0x76   :  { %v362_v41 = vsel %vm1388_vm12, %v212_v19, %v312_v30  ;;  %v363_v51 = vsel %vm1397_vm13, %v213_v28, %v313_v40  ;;  %v121_v12 = vunpack.c.h.bf16 %v85_v0  ;;  %v170_v13 = vsub.f32 %v45_v8, %v120_v4 }
  0x77   :  { %v757_v42 = vadd.f32 %v756_v35, %v361_v34  ;;  %v219_v14 = vmul.f32 %v169_v5, %v169_v5  ;;  %v318_v18 = vmul.f32 4.0, %v218_v6  ;;  %v367_v19 = vsel %vm1439_vm1, %v217_v61, %v317_v7  ;;  %v48_v35 = vld [vmem:[%s1880_s0 + $0xb8] sm:$0xff] }
  0x78   :  { %v122_v22 = vunpack.c.l.bf16 %v86_v16  ;;  %v171_v23 = vsub.f32 %v46_v15, %v121_v12  ;;  %v220_v24 = vmul.f32 %v170_v13, %v170_v13  ;;  %v123_v31 = vunpack.c.h.bf16 %v86_v16 }
  0x79   :  { %v758_v52 = vadd.f32 %v757_v42, %v362_v41  ;;  %v319_v25 = vmul.f32 4.0, %v219_v14  ;;  %v368_v28 = vsel %vm1451_vm2, %v218_v6, %v318_v18  ;;  %vm1472_vm4 = vcmp.eq.f32.partialorder %v120_v4, 0.0  ;;  %v89_v4 = vld [vmem:[%s1879_s1 + $0x70] sm:$0xff] }
  0x7a   :  { %v172_v32 = vsub.f32 %v47_v26, %v122_v22  ;;  %v221_v33 = vmul.f32 %v171_v23, %v171_v23  ;;  %v320_v34 = vmul.f32 4.0, %v220_v24  ;;  %v124_v21 = vunpack.c.l.bf16 %v87_v36 }
  0x7b   :  { %v759_v60 = vadd.f32 %v758_v52, %v363_v51  ;;  %v369_v39 = vsel %vm1460_vm3, %v219_v14, %v319_v25  ;;  %v173_v38 = vsub.f32 %v48_v35, %v123_v31  ;;  %vm1481_vm5 = vcmp.eq.f32.partialorder %v121_v12, 0.0  ;;  %v50_v52 = vld [vmem:[%s1880_s0 + $0xc8] sm:$0xff]  ;;  %v53_v12 = vld [vmem:[%s1880_s0 + $0xe0] sm:$0xff] }
  0x7c   :  { %v222_v41 = vmul.f32 %v172_v32, %v172_v32  ;;  %v321_v42 = vmul.f32 4.0, %v221_v33  ;;  %v370_v44 = vsel %vm1472_vm4, %v220_v24, %v320_v34  ;;  %v125_v48 = vunpack.c.h.bf16 %v87_v36 }
  0x7d   :  { %v760_v3 = vadd.f32 %v759_v60, %v364_v59  ;;  %v174_v49 = vsub.f32 %v49_v43, %v124_v21  ;;  %v223_v50 = vmul.f32 %v173_v38, %v173_v38  ;;  %vm1493_vm6 = vcmp.eq.f32.partialorder %v122_v22, 0.0  ;;  %v90_v22 = vld [vmem:[%s1879_s1 + $0x78] sm:$0xff] }
  0x7e   :  { %v322_v51 = vmul.f32 4.0, %v222_v41  ;;  %v371_v55 = vsel %vm1481_vm5, %v221_v33, %v321_v42  ;;  %v126_v57 = vunpack.c.l.bf16 %v88_v53  ;;  %v175_v58 = vsub.f32 %v50_v52, %v125_v48 }
  0x7f   :  { %v761_v11 = vadd.f32 %v760_v3, %v365_v2  ;;  %v224_v59 = vmul.f32 %v174_v49, %v174_v49  ;;  %v323_v60 = vmul.f32 4.0, %v223_v50  ;;  %vm1502_vm7 = vcmp.eq.f32.partialorder %v123_v31, 0.0  ;;  %v52_v3 = vld [vmem:[%s1880_s0 + $0xd8] sm:$0xff]  ;;  %v55_v31 = vld [vmem:[%s1880_s0 + $0xf0] sm:$0xff] }
  0x80   :  { %v372_v61 = vsel %vm1493_vm6, %v222_v41, %v322_v51  ;;  %v127_v63 = vunpack.c.h.bf16 %v88_v53  ;;  %v176_v0 = vsub.f32 %v51_v29, %v126_v57  ;;  %v225_v1 = vmul.f32 %v175_v58, %v175_v58 }
  0x81   :  { %v762_v20 = vadd.f32 %v761_v11, %v366_v10  ;;  %v324_v2 = vmul.f32 4.0, %v224_v59  ;;  %vm1514_vm8 = vcmp.eq.f32.partialorder %v124_v21, 0.0  ;;  %v373_v6 = vsel %vm1502_vm7, %v223_v50, %v323_v60  ;;  %v91_v21 = vld [vmem:[%s1879_s1 + $0x80] sm:$0xff] }
  0x82   :  { %v128_v8 = vunpack.c.l.bf16 %v89_v4  ;;  %v177_v9 = vsub.f32 %v52_v3, %v127_v63  ;;  %v226_v10 = vmul.f32 %v176_v0, %v176_v0  ;;  %v325_v11 = vmul.f32 4.0, %v225_v1 }
  0x83   :  { %v763_v30 = vadd.f32 %v762_v20, %v367_v19  ;;  %vm1523_vm9 = vcmp.eq.f32.partialorder %v125_v48, 0.0  ;;  %v374_v14 = vsel %vm1514_vm8, %v224_v59, %v324_v2  ;;  %v129_v16 = vunpack.c.h.bf16 %v89_v4  ;;  %v54_v20 = vld [vmem:[%s1880_s0 + $0xe8] sm:$0xff]  ;;  %v57_v48 = vld [vmem:[%s1880_s0 + $0x100] sm:$0xff] }
  0x84   :  { %v178_v17 = vsub.f32 %v53_v12, %v128_v8  ;;  %v227_v18 = vmul.f32 %v177_v9, %v177_v9  ;;  %v326_v19 = vmul.f32 4.0, %v226_v10  ;;  %vm1535_vm10 = vcmp.eq.f32.partialorder %v126_v57, 0.0  ;;  %v92_v57 = vld [vmem:[%s1879_s1 + $0x88] sm:$0xff] }
  0x85   :  { %v764_v40 = vadd.f32 %v763_v30, %v368_v28  ;;  %v375_v24 = vsel %vm1523_vm9, %v225_v1, %v325_v11  ;;  %v130_v26 = vunpack.c.l.bf16 %v90_v22  ;;  %v179_v27 = vsub.f32 %v54_v20, %v129_v16 }
  0x86   :  { %v228_v28 = vmul.f32 %v178_v17, %v178_v17  ;;  %v327_v30 = vmul.f32 4.0, %v227_v18  ;;  %vm1544_vm11 = vcmp.eq.f32.partialorder %v127_v63, 0.0  ;;  %v376_v33 = vsel %vm1535_vm10, %v226_v10, %v326_v19  ;;  %v59_v63 = vld [vmem:[%s1880_s0 + $0x110] sm:$0xff] }
  0x87   :  { %v765_v47 = vadd.f32 %v764_v40, %v369_v39  ;;  %v131_v35 = vunpack.c.h.bf16 %v90_v22  ;;  %v180_v36 = vsub.f32 %v55_v31, %v130_v26  ;;  %v229_v37 = vmul.f32 %v179_v27, %v179_v27  ;;  %v56_v40 = vld [vmem:[%s1880_s0 + $0xf8] sm:$0xff] }
  0x88   :  { %v328_v39 = vmul.f32 4.0, %v228_v28  ;;  %vm1556_vm12 = vcmp.eq.f32.partialorder %v128_v8, 0.0  ;;  %v377_v41 = vsel %vm1544_vm11, %v227_v18, %v327_v30  ;;  %v132_v43 = vunpack.c.l.bf16 %v91_v21  ;;  %v93_v8 = vld [vmem:[%s1879_s1 + $0x90] sm:$0xff] }
  0x89   :  { %v766_v56 = vadd.f32 %v765_v47, %v370_v44  ;;  %v181_v46 = vsub.f32 %v56_v40, %v131_v35  ;;  %v230_v44 = vmul.f32 %v180_v36, %v180_v36  ;;  %v329_v47 = vmul.f32 4.0, %v229_v37 }
  0x8a   :  { %vm1565_vm13 = vcmp.eq.f32.partialorder %v129_v16, 0.0  ;;  %v378_v50 = vsel %vm1556_vm12, %v228_v28, %v328_v39  ;;  %v133_v52 = vunpack.c.h.bf16 %v91_v21  ;;  %v182_v53 = vsub.f32 %v57_v48, %v132_v43  ;;  %v61_v16 = vld [vmem:[%s1880_s0 + $0x120] sm:$0xff] }
  0x8b   :  { %v767_v62 = vadd.f32 %v766_v56, %v371_v55  ;;  %v231_v54 = vmul.f32 %v181_v46, %v181_v46  ;;  %v330_v55 = vmul.f32 4.0, %v230_v44  ;;  %v58_v56 = vld [vmem:[%s1880_s0 + $0x108] sm:$0xff]  ;;  %vm1577_vm14 = vcmp.eq.f32.partialorder %v130_v26, 0.0  ;;  %v94_v26 = vld [vmem:[%s1879_s1 + $0x98] sm:$0xff] }
  0x8c   :  { %v379_v59 = vsel %vm1565_vm13, %v229_v37, %v329_v47  ;;  %v134_v29 = vunpack.c.l.bf16 %v92_v57  ;;  %v183_v45 = vsub.f32 %v58_v56, %v133_v52  ;;  %vm1586_vm15 = vcmp.eq.f32.partialorder %v131_v35, 0.0  ;;  %v63_v35 = vld [vmem:[%s1880_s0 + $0x130] sm:$0xff] }
  0x8d   :  { %v768_v7 = vadd.f32 %v767_v62, %v372_v61  ;;  %v232_v61 = vmul.f32 %v182_v53, %v182_v53  ;;  %v331_v62 = vmul.f32 4.0, %v231_v54  ;;  %v380_v1 = vsel %vm1577_vm14, %v230_v44, %v330_v55 }
  0x8e   :  { %v135_v3 = vunpack.c.h.bf16 %v92_v57  ;;  %v184_v4 = vsub.f32 %v59_v63, %v134_v29  ;;  %v233_v5 = vmul.f32 %v183_v45, %v183_v45  ;;  %vm1598_vm0 = vcmp.eq.f32.partialorder %v132_v43, 0.0  ;;  %v95_v43 = vld [vmem:[%s1879_s1 + $0xa0] sm:$0xff] }
  0x8f   :  { %v769_v15 = vadd.f32 %v768_v7, %v373_v6  ;;  %v332_v6 = vmul.f32 4.0, %v232_v61  ;;  %v60_v7 = vld [vmem:[%s1880_s0 + $0x118] sm:$0xff]  ;;  %v381_v10 = vsel %vm1586_vm15, %v231_v54, %v331_v62  ;;  %v136_v12 = vunpack.c.l.bf16 %v93_v8 }
  0x90   :  { %v185_v13 = vsub.f32 %v60_v7, %v135_v3  ;;  %vm1607_vm1 = vcmp.eq.f32.partialorder %v133_v52, 0.0  ;;  %v137_v20 = vunpack.c.h.bf16 %v93_v8  ;;  %vm1619_vm2 = vcmp.eq.f32.partialorder %v134_v29, 0.0  ;;  %v65_v52 = vld [vmem:[%s1880_s0 + $0x140] sm:$0xff]  ;;  %v96_v29 = vld [vmem:[%s1879_s1 + $0xa8] sm:$0xff] }
  0x91   :  { %v770_v25 = vadd.f32 %v769_v15, %v374_v14  ;;  %v234_v14 = vmul.f32 %v184_v4, %v184_v4  ;;  %v333_v15 = vmul.f32 4.0, %v233_v5  ;;  %v382_v18 = vsel %vm1598_vm0, %v232_v61, %v332_v6 }
  0x92   :  { %v186_v22 = vsub.f32 %v61_v16, %v136_v12  ;;  %v235_v23 = vmul.f32 %v185_v13, %v185_v13  ;;  %v138_v31 = vunpack.c.l.bf16 %v94_v26  ;;  %vm1628_vm3 = vcmp.eq.f32.partialorder %v135_v3, 0.0  ;;  %v67_v3 = vld [vmem:[%s1880_s0 + $0x150] sm:$0xff] }
  0x93   :  { %v771_v34 = vadd.f32 %v770_v25, %v375_v24  ;;  %v334_v24 = vmul.f32 4.0, %v234_v14  ;;  %v62_v25 = vld [vmem:[%s1880_s0 + $0x128] sm:$0xff]  ;;  %v383_v28 = vsel %vm1607_vm1, %v233_v5, %v333_v15  ;;  %v139_v40 = vunpack.c.h.bf16 %v94_v26 }
  0x94   :  { %v187_v32 = vsub.f32 %v62_v25, %v137_v20  ;;  %v188_v21 = vsub.f32 %v63_v35, %v138_v31  ;;  %vm1640_vm4 = vcmp.eq.f32.partialorder %v136_v12, 0.0  ;;  %v140_v48 = vunpack.c.l.bf16 %v95_v43  ;;  %v97_v12 = vld [vmem:[%s1879_s1 + $0xb0] sm:$0xff] }
  0x95   :  { %v772_v42 = vadd.f32 %v771_v34, %v376_v33  ;;  %v236_v33 = vmul.f32 %v186_v22, %v186_v22  ;;  %v335_v34 = vmul.f32 4.0, %v235_v23  ;;  %v384_v37 = vsel %vm1619_vm2, %v234_v14, %v334_v24 }
  0x96   :  { %v237_v38 = vmul.f32 %v187_v32, %v187_v32  ;;  %vm1649_vm5 = vcmp.eq.f32.partialorder %v137_v20, 0.0  ;;  %v141_v56 = vunpack.c.h.bf16 %v95_v43  ;;  %v190_v57 = vsub.f32 %v65_v52, %v140_v48  ;;  %v69_v20 = vld [vmem:[%s1880_s0 + $0x160] sm:$0xff] }
  0x97   :  { %v773_v51 = vadd.f32 %v772_v42, %v377_v41  ;;  %v336_v41 = vmul.f32 4.0, %v236_v33  ;;  %v64_v42 = vld [vmem:[%s1880_s0 + $0x138] sm:$0xff]  ;;  %v385_v44 = vsel %vm1628_vm3, %v235_v23, %v335_v34  ;;  %vm1661_vm6 = vcmp.eq.f32.partialorder %v138_v31, 0.0 }
  0x98   :  { %v189_v49 = vsub.f32 %v64_v42, %v139_v40  ;;  %v142_v63 = vunpack.c.l.bf16 %v96_v29  ;;  %vm1670_vm7 = vcmp.eq.f32.partialorder %v139_v40, 0.0  ;;  %v143_v7 = vunpack.c.h.bf16 %v96_v29  ;;  %v98_v31 = vld [vmem:[%s1879_s1 + $0xb8] sm:$0xff]  ;;  %v71_v40 = vld [vmem:[%s1880_s0 + $0x170] sm:$0xff] }
  0x99   :  { %v774_v60 = vadd.f32 %v773_v51, %v378_v50  ;;  %v238_v50 = vmul.f32 %v188_v21, %v188_v21  ;;  %v337_v51 = vmul.f32 4.0, %v237_v38  ;;  %v386_v54 = vsel %vm1640_vm4, %v236_v33, %v336_v41  ;;  %v697_v21 = vld [vmem:[%s1881_s3] sm:$0xff] }
  0x9a   :  { %v239_v58 = vmul.f32 %v189_v49, %v189_v49  ;;  %v192_v8 = vsub.f32 %v67_v3, %v142_v63  ;;  %vm1682_vm8 = vcmp.eq.f32.partialorder %v140_v48, 0.0  ;;  %v144_v16 = vunpack.c.l.bf16 %v97_v12  ;;  %v99_v48 = vld [vmem:[%s1879_s1 + $0xc0] sm:$0xff] }
  0x9b   :  { %v775_v2 = vadd.f32 %v774_v60, %v379_v59  ;;  %v338_v59 = vmul.f32 4.0, %v238_v50  ;;  %v66_v60 = vld [vmem:[%s1880_s0 + $0x148] sm:$0xff]  ;;  %v387_v61 = vsel %vm1649_vm5, %v237_v38, %v337_v51  ;;  %vm1691_vm9 = vcmp.eq.f32.partialorder %v141_v56, 0.0 }
  0x9c   :  { %v191_v0 = vsub.f32 %v66_v60, %v141_v56  ;;  %v145_v25 = vunpack.c.h.bf16 %v97_v12  ;;  %v194_v26 = vsub.f32 %v69_v20, %v144_v16  ;;  %vm1703_vm10 = vcmp.eq.f32.partialorder %v142_v63, 0.0  ;;  %v73_v56 = vld [vmem:[%s1880_s0 + $0x180] sm:$0xff] }
  0x9d   :  { %v776_v11 = vadd.f32 %v775_v2, %v380_v1  ;;  %v240_v1 = vmul.f32 %v190_v57, %v190_v57  ;;  %v339_v2 = vmul.f32 4.0, %v239_v58  ;;  %v388_v5 = vsel %vm1661_vm6, %v238_v50, %v338_v59 }
  0x9e   :  { %v241_v9 = vmul.f32 %v191_v0, %v191_v0  ;;  %v146_v35 = vunpack.c.l.bf16 %v98_v31  ;;  %vm1712_vm11 = vcmp.eq.f32.partialorder %v143_v7, 0.0  ;;  %v147_v42 = vunpack.c.h.bf16 %v98_v31 }
  0x9f   :  { %v777_v19 = vadd.f32 %v776_v11, %v381_v10  ;;  %v340_v10 = vmul.f32 4.0, %v240_v1  ;;  %v68_v11 = vld [vmem:[%s1880_s0 + $0x158] sm:$0xff]  ;;  %v389_v14 = vsel %vm1670_vm7, %v239_v58, %v339_v2  ;;  %vm1724_vm12 = vcmp.eq.f32.partialorder %v144_v16, 0.0 }
  0xa0   :  { %v193_v17 = vsub.f32 %v68_v11, %v143_v7  ;;  %v196_v43 = vsub.f32 %v71_v40, %v146_v35  ;;  %v148_v52 = vunpack.c.l.bf16 %v99_v48  ;;  %vm1733_vm13 = vcmp.eq.f32.partialorder %v145_v25, 0.0 }
  0xa1   :  { %v778_v30 = vadd.f32 %v777_v19, %v382_v18  ;;  %v242_v18 = vmul.f32 %v192_v8, %v192_v8  ;;  %v341_v19 = vmul.f32 4.0, %v241_v9  ;;  %v390_v23 = vsel %vm1682_vm8, %v240_v1, %v340_v10 }
  0xa2   :  { %v243_v27 = vmul.f32 %v193_v17, %v193_v17  ;;  %v149_v60 = vunpack.c.h.bf16 %v99_v48  ;;  %v198_v29 = vsub.f32 %v73_v56, %v148_v52  ;;  %vm296_vm14 = vcmp.eq.f32.partialorder %v146_v35, 0.0 }
  0xa3   :  { %v779_v39 = vadd.f32 %v778_v30, %v383_v28  ;;  %v342_v28 = vmul.f32 4.0, %v242_v18  ;;  %v70_v30 = vld [vmem:[%s1880_s0 + $0x168] sm:$0xff]  ;;  %v391_v33 = vsel %vm1691_vm9, %v241_v9, %v341_v19  ;;  %vm297_vm15 = vcmp.eq.f32.partialorder %v147_v42, 0.0 }
  0xa4   :  { %v195_v36 = vsub.f32 %v70_v30, %v145_v25  ;;  %v248_v2 = vmul.f32 %v198_v29, %v198_v29  ;;  %vm298_vm0 = vcmp.eq.f32.partialorder %v148_v52, 0.0  ;;  %vm299_vm1 = vcmp.eq.f32.partialorder %v149_v60, 0.0 }
  0xa5   :  { %v780_v47 = vadd.f32 %v779_v39, %v384_v37  ;;  %v244_v37 = vmul.f32 %v194_v26, %v194_v26  ;;  %v343_v39 = vmul.f32 4.0, %v243_v27  ;;  %v392_v38 = vsel %vm1703_vm10, %v242_v18, %v342_v28 }
  0xa6   :  { %v245_v46 = vmul.f32 %v195_v36, %v195_v36  ;;  %v348_v7 = vmul.f32 4.0, %v248_v2  ;;  %vm805_vm2 = vcmask 72704  }
  0xa7   :  { %v781_v55 = vadd.f32 %v780_v47, %v385_v44  ;;  %v344_v44 = vmul.f32 4.0, %v244_v37  ;;  %v72_v47 = vld [vmem:[%s1880_s0 + $0x178] sm:$0xff]  ;;  %v393_v50 = vsel %vm1712_vm11, %v243_v27, %v343_v39 }
  0xa8   :  { %v197_v53 = vsub.f32 %v72_v47, %v147_v42  ;;  %v398_v11 = vsel %vm298_vm0, %v248_v2, %v348_v7  ;;  %v704_v2 = vld [vmem:[%s1881_s3 + $0x38] sm:$0xff] }
  0xa9   :  { %v782_v62 = vadd.f32 %v781_v55, %v386_v54  ;;  %v246_v54 = vmul.f32 %v196_v43, %v196_v43  ;;  %v345_v55 = vmul.f32 4.0, %v245_v46  ;;  %v394_v58 = vsel %vm1724_vm12, %v244_v37, %v344_v44  ;;  %v698_v37 = vld [vmem:[%s1881_s3 + $0x8] sm:$0xff] }
  0xaa   :  { %v247_v45 = vmul.f32 %v197_v53, %v197_v53 }
  0xab   :  { %v783_v6 = vadd.f32 %v782_v62, %v387_v61  ;;  %v346_v61 = vmul.f32 4.0, %v246_v54  ;;  %v74_v62 = vld [vmem:[%s1880_s0 + $0x188] sm:$0xff]  ;;  %v395_v63 = vsel %vm1733_vm13, %v245_v46, %v345_v55  ;;  %v700_v46 = vld [vmem:[%s1881_s3 + $0x18] sm:$0xff] }
  0xac   :  { %v199_v1 = vsub.f32 %v74_v62, %v149_v60  ;;  %v347_v3 = vmul.f32 4.0, %v247_v45  ;;  %v702_v55 = vld [vmem:[%s1881_s3 + $0x28] sm:$0xff] }
  0xad   :  { %v784_v15 = vadd.f32 %v783_v6, %v388_v5  ;;  %v396_v4 = vsel %vm296_vm14, %v246_v54, %v346_v61 }
  0xae   :  { %v249_v6 = vmul.f32 %v199_v1, %v199_v1  ;;  %v397_v8 = vsel %vm297_vm15, %v247_v45, %v347_v3  ;;  %v703_v45 = vld [vmem:[%s1881_s3 + $0x30] sm:$0xff] }
  0xaf   :  { %v785_v24 = vadd.f32 %v784_v15, %v389_v14 }
  0xb0   :  { %v349_v10 = vmul.f32 4.0, %v249_v6 }
  0xb1   :  { %v786_v34 = vadd.f32 %v785_v24, %v390_v23 }
  0xb2   :  { %v399_v13 = vsel %vm299_vm1, %v249_v6, %v349_v10 }
  0xb3   :  { %v787_v41 = vadd.f32 %v786_v34, %v391_v33 }
  0xb5   :  { %v788_v51 = vadd.f32 %v787_v41, %v392_v38  ;;  %v699_v38 = vld [vmem:[%s1881_s3 + $0x10] sm:$0xff] }
  0xb7   :  { %v789_v59 = vadd.f32 %v788_v51, %v393_v50  ;;  %v701_v50 = vld [vmem:[%s1881_s3 + $0x20] sm:$0xff] }
  0xb9   :  { %v790_v0 = vadd.f32 %v789_v59, %v394_v58 }
  0xbb   :  { %v791_v5 = vadd.f32 %v790_v0, %v395_v63 }
  0xbd   :  { %v792_v9 = vadd.f32 %v791_v5, %v396_v4 }
  0xbf   :  { %v793_v12 = vadd.f32 %v792_v9, %v397_v8  ;;  %v705_v8 = vld [vmem:[%s1881_s3 + $0x40] sm:$0xff] }
  0xc1   :  { %v794_v14 = vadd.f32 %v793_v12, %v398_v11 }
  0xc3   :  { %v795_v15 = vadd.f32 %v794_v14, %v399_v13 }
  0xc5   :  { %796 = vadd.xlane.f32.xlu0 %v795_v15  ;;  %v706_v15 = vld [vmem:[%s1881_s3 + $0x48] sm:$0xff] }
 0x101   :  { %v573_v16 = vpop.f32.mrf.mxu0 }
 0x102   :  { %v722_v48 = vmul.f32 %v697_v21, %v573_v16 }
 0x103   :  { %v575_v17 = vpop.f32.mrf.mxu0  ;;  %v1744_v18 = vpop.f32.mrf.mxu1 }
 0x104   :  { %v806_v58 = vsel %vm805_vm2, %v722_v48, 0.0  ;;  %v710_v48 = vld [vmem:[%s1881_s3 + $0x68] sm:$0xff] }
 0x105   :  { %v578_v19 = vpop.f32.mrf.mxu0  ;;  %v640_v20 = vpop.f32.mrf.mxu1 }
 0x106   :  { %v723_v43 = vmul.f32 %v698_v37, %v578_v19 }
 0x107   :  { %v580_v22 = vpop.f32.mrf.mxu0  ;;  %v1746_v23 = vpop.f32.mrf.mxu1 }
 0x108   :  { %v807_v53 = vsel %vm805_vm2, %v723_v43, 0.0 }
 0x109   :  { %v583_v24 = vpop.f32.mrf.mxu0  ;;  %v645_v25 = vpop.f32.mrf.mxu1  ;;  %v808_v29 = vadd.f32 %v807_v53, %v806_v58 }
 0x10a   :  { %v724_v49 = vmul.f32 %v699_v38, %v583_v24  ;;  %v707_v24 = vld [vmem:[%s1881_s3 + $0x50] sm:$0xff] }
 0x10b   :  { %v585_v26 = vpop.f32.mrf.mxu0  ;;  %v1748_v27 = vpop.f32.mrf.mxu1 }
 0x10c   :  { %v809_v59 = vsel %vm805_vm2, %v724_v49, 0.0 }
 0x10d   :  { %v588_v28 = vpop.f32.mrf.mxu0  ;;  %v650_v30 = vpop.f32.mrf.mxu1  ;;  %v810_v1 = vadd.f32 %v809_v59, %v808_v29  ;;  %v735_v59 = vmul.f32 %v710_v48, %v1744_v18  ;;  %v712_v29 = vld [vmem:[%s1881_s3 + $0x78] sm:$0xff] }
 0x10e   :  { %v725_v54 = vmul.f32 %v700_v46, %v588_v28  ;;  %v737_v18 = vmul.f32 %v712_v29, %v1748_v27  ;;  %v716_v27 = vld [vmem:[%s1881_s3 + $0x98] sm:$0xff] }
 0x10f   :  { %v590_v31 = vpop.f32.mrf.mxu0  ;;  %v1750_v32 = vpop.f32.mrf.mxu1 }
 0x110   :  { %v811_v63 = vsel %vm805_vm2, %v725_v54, 0.0 }
 0x111   :  { %v593_v33 = vpop.f32.mrf.mxu0  ;;  %v655_v34 = vpop.f32.mrf.mxu1  ;;  %v812_v7 = vadd.f32 %v811_v63, %v810_v1  ;;  %v713_v1 = vld [vmem:[%s1881_s3 + $0x80] sm:$0xff] }
 0x112   :  { %v726_v60 = vmul.f32 %v701_v50, %v593_v33 }
 0x113   :  { %v595_v35 = vpop.f32.mrf.mxu0  ;;  %v1752_v36 = vpop.f32.mrf.mxu1 }
 0x114   :  { %v813_v5 = vsel %vm805_vm2, %v726_v60, 0.0 }
 0x115   :  { %v598_v39 = vpop.f32.mrf.mxu0  ;;  %v660_v40 = vpop.f32.mrf.mxu1  ;;  %v814_v13 = vadd.f32 %v813_v5, %v812_v7  ;;  %v715_v7 = vld [vmem:[%s1881_s3 + $0x90] sm:$0xff] }
 0x116   :  { %v727_v0 = vmul.f32 %v702_v55, %v598_v39  ;;  %v708_v40 = vld [vmem:[%s1881_s3 + $0x58] sm:$0xff]  ;;  %v711_v55 = vld [vmem:[%s1881_s3 + $0x70] sm:$0xff] }
 0x117   :  { %v600_v41 = vpop.f32.mrf.mxu0  ;;  %v1763_v42 = vpop.f32.mrf.mxu1  ;;  %v736_v63 = vmul.f32 %v711_v55, %v1746_v23  ;;  %v738_v23 = vmul.f32 %v713_v1, %v1750_v32  ;;  %v717_v32 = vld [vmem:[%s1881_s3 + $0xa0] sm:$0xff] }
 0x118   :  { %v815_v11 = vsel %vm805_vm2, %v727_v0, 0.0 }
 0x119   :  { %v603_v44 = vpop.f32.mrf.mxu0  ;;  %v665_v47 = vpop.f32.mrf.mxu1  ;;  %v816_v20 = vadd.f32 %v815_v11, %v814_v13  ;;  %v837_v13 = vsel %vm805_vm2, %v738_v23, 0.0 }
 0x11a   :  { %v728_v6 = vmul.f32 %v703_v45, %v603_v44 }
 0x11b   :  { %v605_v51 = vpop.f32.mrf.mxu0  ;;  %v1771_v52 = vpop.f32.mrf.mxu1 }
 0x11c   :  { %v817_v17 = vsel %vm805_vm2, %v728_v6, 0.0  ;;  %v709_v51 = vld [vmem:[%s1881_s3 + $0x60] sm:$0xff]  ;;  %v833_v6 = vsel %vm805_vm2, %v736_v63, 0.0 }
 0x11d   :  { %v608_v56 = vpop.f32.mrf.mxu0  ;;  %v670_v57 = vpop.f32.mrf.mxu1  ;;  %v818_v30 = vadd.f32 %v817_v17, %v816_v20  ;;  %v741_v17 = vmul.f32 %v716_v27, %v1771_v52  ;;  %v720_v52 = vld [vmem:[%s1881_s3 + $0xb8] sm:$0xff] }
 0x11e   :  { %v729_v12 = vmul.f32 %v704_v2, %v608_v56 }
 0x11f   :  { %v610_v61 = vpop.f32.mrf.mxu0  ;;  %v1782_v62 = vpop.f32.mrf.mxu1 }
 0x120   :  { %v819_v26 = vsel %vm805_vm2, %v729_v12, 0.0 }
 0x121   :  { %v613_v3 = vpop.f32.mrf.mxu0  ;;  %v675_v4 = vpop.f32.mrf.mxu1  ;;  %v820_v37 = vadd.f32 %v819_v26, %v818_v30  ;;  %v843_v26 = vsel %vm805_vm2, %v741_v17, 0.0 }
 0x122   :  { %v730_v19 = vmul.f32 %v705_v8, %v613_v3  ;;  %v831_v3 = vsel %vm805_vm2, %v735_v59, 0.0  ;;  %v714_v4 = vld [vmem:[%s1881_s3 + $0x88] sm:$0xff] }
 0x123   :  { %v615_v9 = vpop.f32.mrf.mxu0  ;;  %v1792_v10 = vpop.f32.mrf.mxu1  ;;  %v739_v11 = vmul.f32 %v714_v4, %v1752_v36  ;;  %v718_v36 = vld [vmem:[%s1881_s3 + $0xa8] sm:$0xff] }
 0x124   :  { %v821_v34 = vsel %vm805_vm2, %v730_v19, 0.0  ;;  %v835_v9 = vsel %vm805_vm2, %v737_v18, 0.0 }
 0x125   :  { %v618_v14 = vpop.f32.mrf.mxu0  ;;  %v680_v16 = vpop.f32.mrf.mxu1  ;;  %v822_v41 = vadd.f32 %v821_v34, %v820_v37 }
 0x126   :  { %v731_v28 = vmul.f32 %v706_v15, %v618_v14  ;;  %v740_v14 = vmul.f32 %v715_v7, %v1763_v42  ;;  %v839_v16 = vsel %vm805_vm2, %v739_v11, 0.0  ;;  %v719_v42 = vld [vmem:[%s1881_s3 + $0xb0] sm:$0xff] }
 0x127   :  { %v620_v22 = vpop.f32.mrf.mxu0  ;;  %v1802_v25 = vpop.f32.mrf.mxu1 }
 0x128   :  { %v823_v38 = vsel %vm805_vm2, %v731_v28, 0.0  ;;  %v841_v20 = vsel %vm805_vm2, %v740_v14, 0.0  ;;  %v742_v22 = vmul.f32 %v717_v32, %v1782_v62  ;;  %v743_v28 = vmul.f32 %v718_v36, %v1792_v10 }
 0x129   :  { %v623_v31 = vpop.f32.mrf.mxu0  ;;  %v685_v33 = vpop.f32.mrf.mxu1  ;;  %v824_v49 = vadd.f32 %v823_v38, %v822_v41 }
 0x12a   :  { %v732_v35 = vmul.f32 %v707_v24, %v623_v31  ;;  %v721_v31 = vld [vmem:[%s1881_s3 + $0xc0] sm:$0xff]  ;;  %v845_v62 = vsel %vm805_vm2, %v742_v22, 0.0  ;;  %v744_v33 = vmul.f32 %v719_v42, %v1802_v25 }
 0x12b   :  { %v625_v39 = vpop.f32.mrf.mxu0  ;;  %v688_v21 = vpop.f32.mrf.mxu1 }
 0x12c   :  { %v825_v44 = vsel %vm805_vm2, %v732_v35, 0.0  ;;  %v847_v35 = vsel %vm805_vm2, %v743_v28, 0.0  ;;  %v745_v37 = vmul.f32 %v720_v52, %v688_v21  ;;  %v849_v10 = vsel %vm805_vm2, %v744_v33, 0.0 }
 0x12d   :  { %v628_v43 = vpop.f32.mrf.mxu0  ;;  %v690_v46 = vpop.f32.mrf.mxu1  ;;  %v826_v56 = vadd.f32 %v825_v44, %v824_v49 }
 0x12e   :  { %v733_v47 = vmul.f32 %v708_v40, %v628_v43  ;;  %v851_v41 = vsel %vm805_vm2, %v745_v37, 0.0 }
 0x12f   :  { %v630_v50 = vpop.f32.mrf.mxu0  ;;  %v693_v53 = vpop.f32.mrf.mxu1 }
 0x130   :  { %v827_v54 = vsel %vm805_vm2, %v733_v47, 0.0  ;;  %v746_v39 = vmul.f32 %v721_v31, %v693_v53 }
 0x131   :  { %v633_v57 = vpop.f32.mrf.mxu0  ;;  %v695_v58 = vpop.f32.mrf.mxu1  ;;  %v828_v45 = vadd.f32 %v827_v54, %v826_v56 }
 0x132   :  { %v734_v60 = vmul.f32 %v709_v51, %v633_v57  ;;  %v853_v43 = vsel %vm805_vm2, %v746_v39, 0.0 }
 0x133   :  { %v635_v61 = vpop.f32.mrf.mxu0 }
 0x134   :  { %v829_v0 = vsel %vm805_vm2, %v734_v60, 0.0 }
 0x135   :  { %v830_v2 = vadd.f32 %v829_v0, %v828_v45 }
 0x137   :  { %v832_v5 = vadd.f32 %v831_v3, %v830_v2 }
 0x139   :  { %v834_v8 = vadd.f32 %v833_v6, %v832_v5 }
 0x13b   :  { %v836_v12 = vadd.f32 %v835_v9, %v834_v8 }
 0x13d   :  { %v838_v15 = vadd.f32 %v837_v13, %v836_v12 }
 0x13f   :  { %v840_v19 = vadd.f32 %v839_v16, %v838_v15 }
 0x141   :  { %v842_v24 = vadd.f32 %v841_v20, %v840_v19 }
 0x143   :  { %v844_v30 = vadd.f32 %v843_v26, %v842_v24 }
 0x145   :  { %v846_v34 = vadd.f32 %v845_v62, %v844_v30 }
 0x147   :  { %v848_v40 = vadd.f32 %v847_v35, %v846_v34 }
 0x149   :  { %v850_v38 = vadd.f32 %v849_v10, %v848_v40 }
 0x14b   :  { %v852_v46 = vadd.f32 %v851_v41, %v850_v38 }
 0x14d   :  { %v854_v44 = vadd.f32 %v853_v43, %v852_v46 }
 0x14e   :  { %v797_v47 = vpop.xlane.xlu0 %796 }
 0x14f   :  { %855 = vadd.xlane.f32.xlu0 %v854_v44  ;;  %v798_v48 = vrot.slane %v797_v47, 4 }
 0x151   :  { %v799_v49 = vadd.f32 %v798_v48, %v797_v47 }
 0x153   :  { %v800_v25 = vrot.slane %v799_v49, 2 }
 0x155   :  { %v801_v50 = vadd.f32 %v800_v25, %v799_v49 }
 0x157   :  { %v802_v51 = vrot.slane %v801_v50, 1 }
 0x159   :  { %v803_v54 = vadd.f32 %v802_v51, %v801_v50 }
 0x15b   :  { %938 = vpush %v803_v54 }
 0x18c   :  { %s939_s3 = spop %938 }
 0x1d8   :  { %v856_v21 = vpop.xlane.xlu0 %855 }
 0x1d9   :  { %v857_v53 = vrot.slane %v856_v21, 4 }
 0x1db   :  { %v858_v55 = vadd.f32 %v857_v53, %v856_v21 }
 0x1dd   :  { %v859_v56 = vrot.slane %v858_v55, 2 }
 0x1df   :  { %v860_v57 = vadd.f32 %v859_v56, %v858_v55 }
 0x1e1   :  { %v861_v58 = vrot.slane %v860_v57, 1 }
 0x1e3   :  { %v862_v59 = vadd.f32 %v861_v58, %v860_v57 }
 0x1e5   :  { %940 = vpush %v862_v59 }
 0x216   :  { %s941_s12 = spop %940 }
 0x217   :  { %s864_s13 = smul.f32 0.05, %s941_s12 }
 0x219   :  { %s865_s14 = sadd.f32 %s939_s3, %s864_s13 }
 0x21b   :  { %v867_v60 = vstv %s865_s14 }
 0x21c   :  { %869 = vst [vmem:[%s1882_s5] sm:$0xff] %v867_v60 }

</bundles_post_ra>
